<compile_context>
chip_gen: v7x
topology: tpu7x:2x2x1
jax: 0.10.0
libtpu: 0.0.40
codegen_flags: <defaults>
</compile_context>

<pallas_src>
import numpy as np

import jax
import jax.numpy as jnp
from jax.experimental import pallas as pl
from jax.experimental.pallas import tpu as pltpu


# ----------------------------- kernel body -------------------------------
def _bottleneck_kernel(x_ref, mu_ref, md_ref, w1_ref, w2_ref, w3_ref,
                       sb12_ref, sb3_ref, o_ref):
    x = x_ref[...]                                        # (R, W*C_in)   f32
    sb12 = sb12_ref[...]                                  # (4, W*C_mid)  f32
    sb3 = sb3_ref[...]                                    # (2, W*C_out)  f32

    # ---- conv1 (1x1) + BN1 + ReLU (block-diagonal matmul, bf16 MXU) ----
    y1 = jnp.dot(x.astype(jnp.bfloat16), w1_ref[...],
                 preferred_element_type=jnp.float32)      # (R, W*C_mid)
    y1 = jnp.maximum(y1 * sb12[0:1] + sb12[1:2], 0.0)

    # ---- conv2 (3x3, pad=1) + BN2 + ReLU: single fused matmul ----------
    # Vertical taps = two XLU row rotations gated by precomputed h-boundary
    # masks (grid-invariant inputs); horizontal taps + their zero padding
    # are baked into the stacked banded weight (3*W*C_mid, W*C_mid).
    R = y1.shape[0]
    up = mu_ref[...] * pltpu.roll(y1, shift=1, axis=0)       # row r-1
    dn = md_ref[...] * pltpu.roll(y1, shift=R - 1, axis=0)   # row r+1
    cat = jnp.concatenate([up, y1, dn], axis=1).astype(jnp.bfloat16)
    acc = jnp.dot(cat, w2_ref[...], preferred_element_type=jnp.float32)
    y2 = jnp.maximum(acc * sb12[2:3] + sb12[3:4], 0.0)       # (R, W*C_mid)

    # ---- conv3 (1x1) + BN3 + residual (f32) + ReLU ---------------------
    y3 = jnp.dot(y2.astype(jnp.bfloat16), w3_ref[...],
                 preferred_element_type=jnp.float32)          # (R, W*C_out)
    y3 = y3 * sb3[0:1] + sb3[1:2]
    o_ref[...] = jnp.maximum(y3 + x, 0.0).astype(o_ref.dtype)


# ------------------------ weight pre-packing -----------------------------
def _pack_params(params, W):
    """Pack channel matmuls into lane-banded matrices (done once, outside the kernel)."""
    w1, w2, w3 = params["w1"], params["w2"], params["w3"]
    C_in, C_mid = w1.shape
    C_out = w3.shape[1]

    eye = jnp.eye(W, dtype=jnp.float32)
    # block-diagonal: lane index = w*C + c -> W independent copies of the 1x1 conv.
    # NOTE: ~W x padded-zero MACs for conv1/conv3 (and ~W/3 x for conv2); fine
    # while latency/HBM-bound, revisit on v5e (slower MXU) at larger shapes.
    w1_bd = jnp.einsum("st,cd->sctd", eye, w1).reshape(W * C_in, W * C_mid)
    w3_bd = jnp.einsum("st,cd->sctd", eye, w3).reshape(W * C_mid, W * C_out)

    # banded matrices: for each vertical tap dh, sum the three horizontal taps
    # dw into one (W*C_mid, W*C_mid) matrix; block (w_src, w_dst) holds
    # W2[dh,dw] iff w_src == w_dst + dw (out-of-range taps are simply absent
    # -> zero padding along W is built in).  Stacked vertically in the order
    # of the in-kernel concat: [up (dh=-1), centre (dh=0), down (dh=+1)].
    bands = []
    for dh_i in range(3):
        b = jnp.zeros((W * C_mid, W * C_mid), jnp.float32)
        for dw_i in range(3):
            dw = dw_i - 1
            shift = jnp.eye(W, k=-dw, dtype=jnp.float32)          # w_src = w_dst + dw
            b = b + jnp.einsum("st,cd->sctd", shift,
                               w2[3 * dh_i + dw_i]).reshape(W * C_mid, W * C_mid)
        bands.append(b)
    w2_bd = jnp.concatenate(bands, axis=0)                        # (3*W*C_mid, W*C_mid)

    tile = lambda v: jnp.tile(v, (1, W))                          # (1,C) -> (1,W*C)
    sb12 = jnp.concatenate([tile(params["s1"]), tile(params["b1"]),
                            tile(params["s2"]), tile(params["b2"])], axis=0)
    sb3 = jnp.concatenate([tile(params["s3"]), tile(params["b3"])], axis=0)
    return dict(
        w1=w1_bd.astype(jnp.bfloat16),
        w2=w2_bd.astype(jnp.bfloat16),
        w3=w3_bd.astype(jnp.bfloat16),
        sb12=sb12, sb3=sb3,
    )


# ------------------------------ wrapper -----------------------------------
def _choose_block_n(N, H, target_rows=1024, min_grid=2):
    """Largest divisor of N with block_n*H <= target_rows and grid_n >= min_grid."""
    min_grid = max(1, min(min_grid, N))
    best = 1
    for d in range(1, N + 1):
        if N % d == 0 and d * H <= target_rows and (N // d) >= min_grid:
            best = d
    return best


def residual_block_3sl(x, params, *, block_n=None, target_rows=1024):
    """x: (N, H, W, C_in) NHWC float32; params: dict of folded weights."""
    N, H, W, C_in = x.shape
    C_mid = params["w1"].shape[1]
    C_out = params["w3"].shape[1]
    assert C_in == C_out, "identity residual requires C_in == expansion*out_channels"
    # Guard the W^2 growth of the block-diagonal packing (VMEM on v7x = 64 MiB).
    # TODO(synk): switch conv1/conv3 to plain (C,C') weights on an (N*H*W, C)
    # slab once W*C exceeds ~2048 lanes (real ResNet widths).
    assert W * max(C_in, C_mid, C_out) <= 2048, "block-diagonal packing too wide for VMEM"

    if block_n is None:
        block_n = _choose_block_n(N, H, target_rows=target_rows)
    block_n = min(block_n, N)
    assert N % block_n == 0, "batch must be divisible by block_n"
    grid_n = N // block_n
    Rb = block_n * H                                   # rows per grid step
    # Each block must contain whole images for the roll-based 3x3 vertical taps.
    assert Rb % H == 0
    Lin, Lmid, Lout = W * C_in, W * C_mid, W * C_out   # lane-packed widths

    p = _pack_params(params, W)
    x2d = x.reshape(N * H, Lin)                        # lane-dense slab

    # grid-invariant h-boundary masks for the vertical 3x3 taps (precomputed
    # here so the kernel carries no per-step iota / %H / selects).
    rows = np.arange(Rb) % H
    mask_up = jnp.asarray((rows >= 1).astype(np.float32).reshape(Rb, 1))
    mask_dn = jnp.asarray((rows <= H - 2).astype(np.float32).reshape(Rb, 1))

    row_spec = lambda L: pl.BlockSpec((Rb, L), lambda n: (n, 0))
    full = lambda a: pl.BlockSpec(a.shape, lambda n, nd=a.ndim: (0,) * nd)

    flops = 2 * N * H * (Lin * Lmid + 3 * Lmid * Lmid + Lmid * Lout)
    bytes_accessed = int(x2d.size * 4 + N * H * Lout * 4 +
                         mask_up.size * 8 +
                         sum(int(np.prod(v.shape)) * v.dtype.itemsize
                             for v in p.values()))

    out2d = pl.pallas_call(
        _bottleneck_kernel,
        out_shape=jax.ShapeDtypeStruct((N * H, Lout), jnp.float32),
        grid_spec=pltpu.PrefetchScalarGridSpec(
            num_scalar_prefetch=0,
            grid=(grid_n,),
            in_specs=[
                row_spec(Lin),
                full(mask_up), full(mask_dn),
                full(p["w1"]), full(p["w2"]), full(p["w3"]),
                full(p["sb12"]), full(p["sb3"]),
            ],
            out_specs=row_spec(Lout),
        ),
        compiler_params=pltpu.CompilerParams(
            dimension_semantics=("parallel",),
            vmem_limit_bytes=32 * 1024 * 1024),
        cost_estimate=pl.CostEstimate(flops=flops, transcendentals=0,
                                      bytes_accessed=bytes_accessed),
    )(x2d, mask_up, mask_dn,
      p["w1"], p["w2"], p["w3"], p["sb12"], p["sb3"])

    return out2d.reshape(N, H, W, C_out)


# ----------------------- pure-JAX reference (NHWC) ------------------------
def reference_forward(x, params):
    bf = lambda a: a.astype(jnp.bfloat16)   # match the kernel's bf16 MXU inputs
    N, H, W, C_in = x.shape
    C_mid = params["w1"].shape[1]
    y1 = jnp.einsum("nhwc,cd->nhwd", bf(x), bf(params["w1"]),
                    preferred_element_type=jnp.float32)
    y1 = jnp.maximum(y1 * params["s1"][0] + params["b1"][0], 0.0)
    yp = jnp.pad(y1, ((0, 0), (1, 1), (1, 1), (0, 0)))
    acc = jnp.zeros((N, H, W, C_mid), jnp.float32)
    for t in range(9):
        dh, dw = t // 3, t % 3
        acc = acc + jnp.einsum("nhwc,cd->nhwd",
                               bf(yp[:, dh:dh + H, dw:dw + W, :]),
                               bf(params["w2"][t]),
                               preferred_element_type=jnp.float32)
    y2 = jnp.maximum(acc * params["s2"][0] + params["b2"][0], 0.0)
    y3 = jnp.einsum("nhwc,cd->nhwd", bf(y2), bf(params["w3"]),
                    preferred_element_type=jnp.float32)
    y3 = y3 * params["s3"][0] + params["b3"][0]
    return jnp.maximum(y3 + x, 0.0)


def make_params(key, c_in, c_mid, c_out, eps=1e-5):
    ks = jax.random.split(key, 12)

    def fold_bn(kg, kb, km, kv, c):
        gamma = 1.0 + 0.1 * jax.random.normal(kg, (c,), jnp.float32)
        beta = 0.1 * jax.random.normal(kb, (c,), jnp.float32)
        mean = 0.1 * jax.random.normal(km, (c,), jnp.float32)
        var = jnp.abs(jax.random.normal(kv, (c,), jnp.float32)) + 0.5
        scale = gamma / jnp.sqrt(var + eps)
        bias = beta - mean * scale
        return scale.reshape(1, c), bias.reshape(1, c)

    w1 = 0.2 * jax.random.normal(ks[0], (c_in, c_mid), jnp.float32)
    w2 = 0.2 * jax.random.normal(ks[1], (9, c_mid, c_mid), jnp.float32)
    w3 = 0.2 * jax.random.normal(ks[2], (c_mid, c_out), jnp.float32)
    s1, b1 = fold_bn(ks[3], ks[4], ks[5], ks[6], c_mid)
    s2, b2 = fold_bn(ks[7], ks[8], ks[9], ks[10], c_mid)
    s3, b3 = fold_bn(ks[11], ks[3], ks[7], ks[0], c_out)
    return dict(w1=w1, w2=w2, w3=w3, s1=s1, b1=b1, s2=s2, b2=b2, s3=s3, b3=b3)


if __name__ == "__main__":
    # ResidualBlock_3sl(in_channels=16, out_channels=4) -> out channels = 4*4 = 16
    # W * C_in = 8 * 16 = 128 -> lane-dense activation slab.
    # N=16 so block_n auto-picks 8 (Rb = 64 rows/step) with grid_n = 2, keeping
    # both v7x TensorCores busy while still being a small, fast demo.
    N, H, W = 16, 8, 8
    C_mid = 4
    C_in = C_out = C_mid * 4  # expansion = 4, identity residual

    key = jax.random.PRNGKey(0)
    kx, kp = jax.random.split(key)
    x = jax.random.normal(kx, (N, H, W, C_in), jnp.float32)
    params = make_params(kp, C_in, C_mid, C_out)

    out = residual_block_3sl(x, params)
    out = jax.block_until_ready(out)

    ref = jax.block_until_ready(reference_forward(x, params))
    # bf16 MXU operands -> matches the bf16-cast reference to 5e-3, not exact f32.
    np.testing.assert_allclose(np.asarray(out), np.asarray(ref), atol=5e-3, rtol=5e-3)

    print("KERNEL_OK")
</pallas_src>

<mosaic_0001>
module attributes {stable_mosaic.version = 11 : i64} {
  func.func @_bottleneck_kernel(%arg0: i32, %arg1: memref<64x128xf32, #tpu.memory_space<vmem>>, %arg2: memref<64x1xf32, #tpu.memory_space<vmem>>, %arg3: memref<64x1xf32, #tpu.memory_space<vmem>>, %arg4: memref<128x32xbf16, #tpu.memory_space<vmem>>, %arg5: memref<96x32xbf16, #tpu.memory_space<vmem>>, %arg6: memref<32x128xbf16, #tpu.memory_space<vmem>>, %arg7: memref<4x32xf32, #tpu.memory_space<vmem>>, %arg8: memref<2x128xf32, #tpu.memory_space<vmem>>, %arg9: memref<64x128xf32, #tpu.memory_space<vmem>>) attributes {dimension_semantics = [#tpu.dimension_semantics<parallel>], iteration_bounds = array<i64: 2>, scalar_prefetch = 0 : i64, scratch_operands = 0 : i64, tpu.core_type = #tpu.core_type<tc>, window_params = [{transform_indices = @transform_0, window_bounds = array<i64: 64, 128>}, {pipeline_mode = #tpu.pipeline_mode<synchronous>, transform_indices = @transform_1, window_bounds = array<i64: 64, 1>}, {pipeline_mode = #tpu.pipeline_mode<synchronous>, transform_indices = @transform_2, window_bounds = array<i64: 64, 1>}, {pipeline_mode = #tpu.pipeline_mode<synchronous>, transform_indices = @transform_3, window_bounds = array<i64: 128, 32>}, {pipeline_mode = #tpu.pipeline_mode<synchronous>, transform_indices = @transform_4, window_bounds = array<i64: 96, 32>}, {pipeline_mode = #tpu.pipeline_mode<synchronous>, transform_indices = @transform_5, window_bounds = array<i64: 32, 128>}, {pipeline_mode = #tpu.pipeline_mode<synchronous>, transform_indices = @transform_6, window_bounds = array<i64: 4, 32>}, {pipeline_mode = #tpu.pipeline_mode<synchronous>, transform_indices = @transform_7, window_bounds = array<i64: 2, 128>}, {transform_indices = @transform_8, window_bounds = array<i64: 64, 128>}]} {
    %c0 = arith.constant 0 : index
    %c0_0 = arith.constant 0 : index
    %0 = vector.load %arg1[%c0, %c0_0] : memref<64x128xf32, #tpu.memory_space<vmem>>, vector<64x128xf32>
    %c0_1 = arith.constant 0 : index
    %c0_2 = arith.constant 0 : index
    %1 = vector.load %arg7[%c0_1, %c0_2] : memref<4x32xf32, #tpu.memory_space<vmem>>, vector<4x32xf32>
    %c0_3 = arith.constant 0 : index
    %c0_4 = arith.constant 0 : index
    %2 = vector.load %arg8[%c0_3, %c0_4] : memref<2x128xf32, #tpu.memory_space<vmem>>, vector<2x128xf32>
    %3 = arith.truncf %0 : vector<64x128xf32> to vector<64x128xbf16>
    %c0_5 = arith.constant 0 : index
    %c0_6 = arith.constant 0 : index
    %4 = vector.load %arg4[%c0_5, %c0_6] : memref<128x32xbf16, #tpu.memory_space<vmem>>, vector<128x32xbf16>
    %cst = arith.constant dense<0.000000e+00> : vector<64x32xf32>
    %5 = tpu.matmul %3, %4, %cst {dimension_numbers = #tpu.dot_dimension_numbers<[1], [0], [0], [1], [0, 0, 1, 1], [], []>} : vector<64x128xbf16>, vector<128x32xbf16>, vector<64x32xf32> -> vector<64x32xf32>
    %6 = vector.extract_strided_slice %1 {offsets = [0, 0], sizes = [1, 32], strides = [1, 1]} : vector<4x32xf32> to vector<1x32xf32>
    %7 = vector.broadcast %6 : vector<1x32xf32> to vector<64x32xf32>
    %8 = arith.mulf %5, %7 : vector<64x32xf32>
    %9 = vector.extract_strided_slice %1 {offsets = [1, 0], sizes = [1, 32], strides = [1, 1]} : vector<4x32xf32> to vector<1x32xf32>
    %10 = vector.broadcast %9 : vector<1x32xf32> to vector<64x32xf32>
    %11 = arith.addf %8, %10 : vector<64x32xf32>
    %cst_7 = arith.constant 0.000000e+00 : f32
    %12 = vector.broadcast %cst_7 : f32 to vector<64x32xf32>
    %13 = arith.maximumf %11, %12 : vector<64x32xf32>
    %c0_8 = arith.constant 0 : index
    %c0_9 = arith.constant 0 : index
    %14 = vector.load %arg2[%c0_8, %c0_9] : memref<64x1xf32, #tpu.memory_space<vmem>>, vector<64x1xf32>
    %c1_i32 = arith.constant 1 : i32
    %15 = tpu.dynamic_rotate %13 by %c1_i32 dim 0 : vector<64x32xf32>, i32 -> vector<64x32xf32>
    %16 = vector.broadcast %14 : vector<64x1xf32> to vector<64x32xf32>
    %17 = arith.mulf %16, %15 : vector<64x32xf32>
    %c0_10 = arith.constant 0 : index
    %c0_11 = arith.constant 0 : index
    %18 = vector.load %arg3[%c0_10, %c0_11] : memref<64x1xf32, #tpu.memory_space<vmem>>, vector<64x1xf32>
    %c63_i32 = arith.constant 63 : i32
    %19 = tpu.dynamic_rotate %13 by %c63_i32 dim 0 : vector<64x32xf32>, i32 -> vector<64x32xf32>
    %20 = vector.broadcast %18 : vector<64x1xf32> to vector<64x32xf32>
    %21 = arith.mulf %20, %19 : vector<64x32xf32>
    %22 = tpu.concatenate %17, %13, %21 in 1 : vector<64x32xf32>, vector<64x32xf32>, vector<64x32xf32> -> vector<64x96xf32>
    %23 = arith.truncf %22 : vector<64x96xf32> to vector<64x96xbf16>
    %c0_12 = arith.constant 0 : index
    %c0_13 = arith.constant 0 : index
    %24 = vector.load %arg5[%c0_12, %c0_13] : memref<96x32xbf16, #tpu.memory_space<vmem>>, vector<96x32xbf16>
    %cst_14 = arith.constant dense<0.000000e+00> : vector<64x32xf32>
    %25 = tpu.matmul %23, %24, %cst_14 {dimension_numbers = #tpu.dot_dimension_numbers<[1], [0], [0], [1], [0, 0, 1, 1], [], []>} : vector<64x96xbf16>, vector<96x32xbf16>, vector<64x32xf32> -> vector<64x32xf32>
    %26 = vector.extract_strided_slice %1 {offsets = [2, 0], sizes = [1, 32], strides = [1, 1]} : vector<4x32xf32> to vector<1x32xf32>
    %27 = vector.broadcast %26 : vector<1x32xf32> to vector<64x32xf32>
    %28 = arith.mulf %25, %27 : vector<64x32xf32>
    %29 = vector.extract_strided_slice %1 {offsets = [3, 0], sizes = [1, 32], strides = [1, 1]} : vector<4x32xf32> to vector<1x32xf32>
    %30 = vector.broadcast %29 : vector<1x32xf32> to vector<64x32xf32>
    %31 = arith.addf %28, %30 : vector<64x32xf32>
    %cst_15 = arith.constant 0.000000e+00 : f32
    %32 = vector.broadcast %cst_15 : f32 to vector<64x32xf32>
    %33 = arith.maximumf %31, %32 : vector<64x32xf32>
    %34 = arith.truncf %33 : vector<64x32xf32> to vector<64x32xbf16>
    %c0_16 = arith.constant 0 : index
    %c0_17 = arith.constant 0 : index
    %35 = vector.load %arg6[%c0_16, %c0_17] : memref<32x128xbf16, #tpu.memory_space<vmem>>, vector<32x128xbf16>
    %cst_18 = arith.constant dense<0.000000e+00> : vector<64x128xf32>
    %36 = tpu.matmul %34, %35, %cst_18 {dimension_numbers = #tpu.dot_dimension_numbers<[1], [0], [0], [1], [0, 0, 1, 1], [], []>} : vector<64x32xbf16>, vector<32x128xbf16>, vector<64x128xf32> -> vector<64x128xf32>
    %37 = vector.extract_strided_slice %2 {offsets = [0, 0], sizes = [1, 128], strides = [1, 1]} : vector<2x128xf32> to vector<1x128xf32>
    %38 = vector.broadcast %37 : vector<1x128xf32> to vector<64x128xf32>
    %39 = arith.mulf %36, %38 : vector<64x128xf32>
    %40 = vector.extract_strided_slice %2 {offsets = [1, 0], sizes = [1, 128], strides = [1, 1]} : vector<2x128xf32> to vector<1x128xf32>
    %41 = vector.broadcast %40 : vector<1x128xf32> to vector<64x128xf32>
    %42 = arith.addf %39, %41 : vector<64x128xf32>
    %43 = arith.addf %42, %0 : vector<64x128xf32>
    %cst_19 = arith.constant 0.000000e+00 : f32
    %44 = vector.broadcast %cst_19 : f32 to vector<64x128xf32>
    %45 = arith.maximumf %43, %44 : vector<64x128xf32>
    %c0_20 = arith.constant 0 : index
    %c0_21 = arith.constant 0 : index
    %46 = vector.load %arg9[%c0_20, %c0_21] : memref<64x128xf32, #tpu.memory_space<vmem>>, vector<64x128xf32>
    tpu.vector_store %arg9[%c0_20, %c0_21], %45 {strides = array<i32>} : memref<64x128xf32, #tpu.memory_space<vmem>>, vector<64x128xf32>,
    return
  }
  func.func @transform_0(%arg0: i32) -> (i32, i32) {
    %c0_i32 = arith.constant 0 : i32
    %c0_i32_0 = arith.constant 0 : i32
    return %arg0, %c0_i32 : i32, i32
  }
  func.func @transform_1(%arg0: i32) -> (i32, i32) {
    %c0_i32 = arith.constant 0 : i32
    %c0_i32_0 = arith.constant 0 : i32
    %c0_i32_1 = arith.constant 0 : i32
    return %c0_i32, %c0_i32_0 : i32, i32
  }
  func.func @transform_2(%arg0: i32) -> (i32, i32) {
    %c0_i32 = arith.constant 0 : i32
    %c0_i32_0 = arith.constant 0 : i32
    %c0_i32_1 = arith.constant 0 : i32
    return %c0_i32, %c0_i32_0 : i32, i32
  }
  func.func @transform_3(%arg0: i32) -> (i32, i32) {
    %c0_i32 = arith.constant 0 : i32
    %c0_i32_0 = arith.constant 0 : i32
    %c0_i32_1 = arith.constant 0 : i32
    return %c0_i32, %c0_i32_0 : i32, i32
  }
  func.func @transform_4(%arg0: i32) -> (i32, i32) {
    %c0_i32 = arith.constant 0 : i32
    %c0_i32_0 = arith.constant 0 : i32
    %c0_i32_1 = arith.constant 0 : i32
    return %c0_i32, %c0_i32_0 : i32, i32
  }
  func.func @transform_5(%arg0: i32) -> (i32, i32) {
    %c0_i32 = arith.constant 0 : i32
    %c0_i32_0 = arith.constant 0 : i32
    %c0_i32_1 = arith.constant 0 : i32
    return %c0_i32, %c0_i32_0 : i32, i32
  }
  func.func @transform_6(%arg0: i32) -> (i32, i32) {
    %c0_i32 = arith.constant 0 : i32
    %c0_i32_0 = arith.constant 0 : i32
    %c0_i32_1 = arith.constant 0 : i32
    return %c0_i32, %c0_i32_0 : i32, i32
  }
  func.func @transform_7(%arg0: i32) -> (i32, i32) {
    %c0_i32 = arith.constant 0 : i32
    %c0_i32_0 = arith.constant 0 : i32
    %c0_i32_1 = arith.constant 0 : i32
    return %c0_i32, %c0_i32_0 : i32, i32
  }
  func.func @transform_8(%arg0: i32) -> (i32, i32) {
    %c0_i32 = arith.constant 0 : i32
    %c0_i32_0 = arith.constant 0 : i32
    return %arg0, %c0_i32 : i32, i32
  }
}

</mosaic_0001>

<bundles_post_ra>
// kernel: tpu_custom_call.1
= control target key start
LH: loop header
LB: loop body
LE: loop exit
PB: predicated region body
PF: predicated region fallthrough
CT: control target
= control target key end

     0   :  { %13 = vsyncpa [#allocation3], 0  ;;  %s1825_s0 = inlined_call_operand.vmem [shape: f32[128,128], index: 0, kind: input, shape index: {}]   ;;  %s1826_s1 = inlined_call_operand.vmem [shape: f32[64,1], index: 1, kind: input, shape index: {}]   ;;  %s1827_s2 = inlined_call_operand.vmem [shape: f32[64,1], index: 2, kind: input, shape index: {}]   ;;  %s1828_s3 = inlined_call_operand.vmem [shape: bf16[128,32], index: 3, kind: input, shape index: {}]   ;;  %s1829_s4 = inlined_call_operand.vmem [shape: bf16[96,32], index: 4, kind: input, shape index: {}]   ;;  %s1830_s5 = inlined_call_operand.vmem [shape: bf16[32,128], index: 5, kind: input, shape index: {}]   ;;  %s1831_s6 = inlined_call_operand.vmem [shape: f32[4,32], index: 6, kind: input, shape index: {}]   ;;  %s1832_s7 = inlined_call_operand.vmem [shape: f32[2,128], index: 7, kind: input, shape index: {}]   ;;  %s1833_s8 = inlined_call_operand.hbm [shape: f32[128,128], index: 8, kind: output, shape index: {}]  }
   0x1   :  { %15 = vsyncpa [#allocation3 + $0x1], 0  ;;  %s1434_s27 = smov 0   ;;  %s1436_s28 = smov 0  }
   0x2   :  { %s1438_s29 = smov 0   ;;  %s1440_s30 = smov 0  }
   0x3 LB: > { %s1455_s9 = sadd.s32 4294967295, %s1381_s30   ;;  %s1096_s10 = sadd.s32 4294967294, %s1381_s30   ;;  %s1381_s30 = sphi %s1440_s30, %s1839_s30   ;;  %s1377_s29 = sphi %s1438_s29, %s1838_s29   ;;  %s1373_s28 = sphi %s1436_s28, %s1837_s28   ;;  %s1369_s27 = sphi %s1434_s27, %s1836_s27  }
   0x4   : > { %s1459_s11 = sadd.s32 1, %s1381_s30   ;;  %s201_s12 = sadd.s32 1, %s1377_s29 }
   0x5   : > { %s198_s13 = ssub.s32 %s1381_s30, %s1459_s11  ;;  %p211_p0 = scmp.ne.s32.totalorder %s1377_s29, %s1373_s28 }
   0x6   : > { %p199_p1 = scmp.eq.s32.totalorder %s198_s13, 0  ;;  %p212_p2 = scmp.eq.s32.totalorder %s1455_s9, 1 }
   0x7   : > { %p217_p3 = scmp.ne.s32.totalorder %s1373_s28, %s1369_s27  ;;  %p218_p4 = scmp.eq.s32.totalorder %s1096_s10, 1 }
   0x8   : > { %s1470_s14 = scalar_select %p199_p1, %s1377_s29, %s201_s12  }
   0x9   : > { %p1472_p5 = por %p212_p2, %p211_p0  ;;  %p1476_p6 = por %p218_p4, %p217_p3 }
   0xa   : > { %p1099_p7 = scmp.ge.s32.totalorder %s1381_s30, 1  ;;  %p266_p8 = scmp.lt.s32.totalorder %s1381_s30, 3 }
   0xc   : > { %p267_p9 = pnand %p1099_p7, %p266_p8 }
   0xd   : > { %v1303_v0 = vld [vmem:[%s1828_s3] sm:$0xff] (!%p267_p9)   ;;  %s1101_s19 = sshll.u32 (!%p267_p9), %s1455_s9, 3  ;;  %v1304_v1 = vld [vmem:[%s1828_s3 + $0x8] sm:$0xff] (!%p267_p9)   ;;  %v1383_v2 = vmov (!%p267_p9), 0   ;;  %v1305_v3 = vld [vmem:[%s1828_s3 + $0x10] sm:$0xff] (!%p267_p9)   ;;  %v451_v39 = vlaneseq (!%p267_p9)  ;;  %s1384_s20 = smov (!%p267_p9), 32  }
   0xe   : > { %270 = sbr.rel (%p267_p9) target bundleno = 870 (0x366), region = 52  ;;  %p301_p10 = scmp.lt.s32.totalorder (!%p267_p9), %s1101_s19, 15  ;;  %1161 = vmatprep.subr.bf16.mxu0 (!%p267_p9), %v1303_v0  ;;  %1261 = vset.pattern.permute.xlu0 (!%p267_p9), %v1383_v2  ;;  %v1306_v4 = vld [vmem:[%s1828_s3 + $0x18] sm:$0xff] (!%p267_p9)   ;;  %v558_v8 = vld [vmem:[%s1827_s2] sm:$0xff] (!%p267_p9)  ;;  %v560_v9 = vld [vmem:[%s1827_s2 + $0x10] sm:$0xff] (!%p267_p9)  ;;  %vm695_vm2 = vcmask (!%p267_p9), 261120  }
   0xf   : > { %1162 = vmatpush3.bf16.msra.mxu0 (!%p267_p9), %v1303_v0  ;;  %1262 = vset.pattern.permute.xlu1 (!%p267_p9), %v1383_v2  ;;  %v1307_v10 = vld [vmem:[%s1828_s3 + $0x20] sm:$0xff] (!%p267_p9)   ;;  %v559_v11 = vld [vmem:[%s1827_s2 + $0x8] sm:$0xff] (!%p267_p9)  ;;  %v561_v12 = vld [vmem:[%s1827_s2 + $0x18] sm:$0xff] (!%p267_p9)  ;;  %v1598_v40 = vshrl.u32 (!%p267_p9), %v451_v39, 7  ;;  %vm704_vm3 = vcmask (!%p267_p9), 523264   ;;  %vm765_vm4 = vcmask (!%p267_p9), 785408  }
  0x10   : > { %1163 = vmatprep.subr.bf16.mxu0 (!%p267_p9), %v1304_v1  ;;  %585 = vperm.xlu0 (!%p267_p9), %1261, %v558_v8   ;;  %v1308_v13 = vld [vmem:[%s1828_s3 + $0x28] sm:$0xff] (!%p267_p9)   ;;  %v562_v14 = vld [vmem:[%s1827_s2 + $0x20] sm:$0xff] (!%p267_p9)  ;;  %v1309_v16 = vld [vmem:[%s1828_s3 + $0x30] sm:$0xff] (!%p267_p9)   ;;  %s297_s17 = sand.u32 (!%p267_p9), 1, %s1373_s28   ;;  %s1386_s25 = smov (!%p267_p9), [#allocation2]  }
  0x11   : > { %595 = vperm.xlu1 (!%p267_p9), %1262, %v560_v9   ;;  %v563_v15 = vld [vmem:[%s1827_s2 + $0x28] sm:$0xff] (!%p267_p9)  ;;  %v564_v17 = vld [vmem:[%s1827_s2 + $0x30] sm:$0xff] (!%p267_p9)  ;;  %v565_v18 = vld [vmem:[%s1827_s2 + $0x38] sm:$0xff] (!%p267_p9)  ;;  %v453_v41 = vsub.s32 (!%p267_p9), 0, %v1598_v40  ;;  %v465_v43 = vsub.s32 (!%p267_p9), 1, %v1598_v40  ;;  %vm501_vm0 = vcmp.lt.s32.totalorder (!%p267_p9), %v1598_v40, 1 }
  0x12   : > { %v1310_v19 = vld [vmem:[%s1828_s3 + $0x38] sm:$0xff] (!%p267_p9)   ;;  %v483_v20 = vld [vmem:[%s1826_s1] sm:$0xff] (!%p267_p9)  ;;  %v484_v21 = vld [vmem:[%s1826_s1 + $0x8] sm:$0xff] (!%p267_p9)  ;;  %vm574_vm1 = vcmp.lt.s32.totalorder (!%p267_p9), %v1598_v40, 7  ;;  %s1100_s18 = sshll.u32 (!%p267_p9), %s297_s17, 6  ;;  %s1323_s26 = sshll.u32 (!%p267_p9), %s1386_s25, 4  ;;  %s1324_s26 = int_to_ptr.vmem [resolvable:$false] %s1323_s26 }
  0x13   : > { %1164 = vmatpush3.bf16.msra.mxu0 (!%p267_p9), %v1304_v1  ;;  %v485_v26 = vld [vmem:[%s1826_s1 + $0x10] sm:$0xff] (!%p267_p9)  ;;  %v486_v28 = vld [vmem:[%s1826_s1 + $0x18] sm:$0xff] (!%p267_p9)  ;;  %v487_v30 = vld [vmem:[%s1826_s1 + $0x20] sm:$0xff] (!%p267_p9)  ;;  %s1325_s12 = scalar_lea.vmem (!%p267_p9), %s1324_s26, 2048 }
  0x14   : > { %1165 = vmatprep.subr.bf16.mxu0 (!%p267_p9), %v1305_v3  ;;  %590 = vperm.xlu0 (!%p267_p9), %1261, %v559_v11   ;;  %v488_v31 = vld [vmem:[%s1826_s1 + $0x28] sm:$0xff] (!%p267_p9)  ;;  %v489_v34 = vld [vmem:[%s1826_s1 + $0x30] sm:$0xff] (!%p267_p9)  ;;  %v490_v36 = vld [vmem:[%s1826_s1 + $0x38] sm:$0xff] (!%p267_p9) }
  0x15   : > { %s1841_s19 = smov (!%p301_p10, %s1101_s19), 15  ;;  %600 = vperm.xlu1 %1262, %v561_v12   ;;  %v1311_v37 = vld [vmem:[%s1829_s4] sm:$0xff]   ;;  %v1312_v38 = vld [vmem:[%s1829_s4 + $0x8] sm:$0xff]   ;;  %v1313_v47 = vld [vmem:[%s1829_s4 + $0x10] sm:$0xff]  }
  0x16   : > { %s1102_s24 = sshll.u32 %s1841_s19, 3  ;;  %1185 = vmatprep.subr.bf16.mxu1 %v1311_v37  ;;  %v1604_v42 = vld [vmem:[%s1831_s6] sm:$0xf]  ;;  %v1314_v48 = vld [vmem:[%s1829_s4 + $0x18] sm:$0xff]   ;;  %s1759_s19 = scalar_lea.vmem [#allocation2], %s1100_s18 }
  0x17   : > { %s1495_s10 = scalar_lea.vmem %s1825_s0, %s1102_s24  ;;  %1166 = vmatpush3.bf16.msra.mxu0 %v1305_v3  ;;  %1186 = vmatpush3.bf16.msra.mxu1 %v1311_v37  ;;  %v454_v44 = vrot.slane %v1604_v42, %v453_v41  ;;  %v466_v45 = vrot.slane %v1604_v42, %v465_v43  ;;  %v1315_v63 = vld [vmem:[%s1829_s4 + $0x20] sm:$0xff]   ;;  %s1034_s21 = sshll.u32 %s1759_s19, 4  ;;  %s1777_s21 = int_to_ptr.vmem [resolvable:$true] %s1034_s21 }
  0x18   : > { %v1501_v5 = vld [vmem:[%s1495_s10] sm:$0xff]  ;;  %v1504_v6 = vld [vmem:[%s1495_s10 + $0x8] sm:$0xff]  ;;  %1167 = vmatprep.subr.bf16.mxu0 %v1306_v4  ;;  %605 = vperm.xlu0 %1261, %v562_v14   ;;  %v1551_v22 = vld [vmem:[%s1495_s10 + $0x10] sm:$0xff]  ;;  %s1319_s24 = scalar_lea.vmem %s1777_s21, 1024  ;;  %p1326_p0 = scmp.lt.s32.totalorder %s1777_s21, %s1324_s26 }
  0x19   : > { %v318_v7 = vpack.c.bf16 %v1504_v6, %v1501_v5  ;;  %610 = vperm.xlu1 %1262, %v563_v15   ;;  %v1554_v23 = vld [vmem:[%s1495_s10 + $0x18] sm:$0xff]  ;;  %v1557_v24 = vld [vmem:[%s1495_s10 + $0x20] sm:$0xff]  ;;  %v1560_v25 = vld [vmem:[%s1495_s10 + $0x28] sm:$0xff]  ;;  %1187 = vmatprep.subr.bf16.mxu1 %v1312_v38  ;;  %p1320_p11 = scmp.ne.s32.totalorder %s1777_s21, %s1319_s24  ;;  %p1327_p1 = scmp.lt.s32.totalorder %s1325_s12, %s1319_s24 }
  0x1a   : > { %v319_v27 = vpack.c.bf16 %v1554_v23, %v1551_v22  ;;  %v320_v29 = vpack.c.bf16 %v1560_v25, %v1557_v24  ;;  %v1579_v32 = vld [vmem:[%s1495_s10 + $0x30] sm:$0xff]  ;;  %v1582_v33 = vld [vmem:[%s1495_s10 + $0x38] sm:$0xff]  ;;  %s1385_s10 = smov 64  }
  0x1b   : > { %1177 = vmatprep.mubr.bf16.mxu0 %v318_v7  ;;  %1168 = vmatpush3.bf16.msra.mxu0 %v1306_v4  ;;  %v321_v35 = vpack.c.bf16 %v1582_v33, %v1579_v32  ;;  %p1321_p12 = pnand %p1320_p11, %p1472_p5  ;;  %p1328_p2 = por %p1327_p1, %p1326_p0 }
  0x1c   : > { %1169 = vmatprep.subr.bf16.mxu0 %v1307_v10  ;;  %615 = vperm.xlu0 %1261, %v564_v17  }
  0x1d   : > { %620 = vperm.xlu1 %1262, %v565_v18   ;;  %1188 = vmatpush3.bf16.msra.mxu1 %v1312_v38  ;;  %v1316_v38 = vld [vmem:[%s1829_s4 + $0x28] sm:$0xff]   ;;  %p1322_p13 = pneg %p1321_p12 }
  0x1e   : > { %1189 = vmatprep.subr.bf16.mxu1 %v1313_v47 }
  0x1f   : > { %1170 = vmatpush3.bf16.msra.mxu0 %v1307_v10  ;;  %p1329_p3 = pnand %p1328_p2, %p1322_p13 }
  0x20   : > { %1171 = vmatprep.subr.bf16.mxu0 %v1308_v13  ;;  %512 = vperm.xlu0 %1261, %v483_v20  }
  0x21   : > { %517 = vperm.xlu1 %1262, %v484_v21   ;;  %1190 = vmatpush3.bf16.msra.mxu1 %v1313_v47 }
  0x22   : > { %1191 = vmatprep.subr.bf16.mxu1 %v1314_v48 }
  0x23   : > { %1172 = vmatpush3.bf16.msra.mxu0 %v1308_v13 }
  0x24   : > { %1173 = vmatprep.subr.bf16.mxu0 %v1309_v16  ;;  %522 = vperm.xlu0 %1261, %v485_v26  }
  0x25   : > { %527 = vperm.xlu1 %1262, %v486_v28   ;;  %1192 = vmatpush3.bf16.msra.mxu1 %v1314_v48 }
  0x26   : > { %1193 = vmatprep.subr.bf16.mxu1 %v1315_v63 }
  0x27   : > { %1174 = vmatpush3.bf16.msra.mxu0 %v1309_v16 }
  0x28   : > { %1175 = vmatprep.subr.bf16.mxu0 %v1310_v19  ;;  %532 = vperm.xlu0 %1261, %v487_v30  }
  0x29   : > { %537 = vperm.xlu1 %1262, %v488_v31   ;;  %1194 = vmatpush3.bf16.msra.mxu1 %v1315_v63 }
  0x2a   : > { %1195 = vmatprep.subr.bf16.mxu1 %v1316_v38 }
  0x2b   : > { %1176 = vmatpush3.bf16.msra.mxu0 %v1310_v19 }
  0x2c   : > { %542 = vperm.xlu0 %1261, %v489_v34  }
  0x2d   : > { %547 = vperm.xlu1 %1262, %v490_v36   ;;  %1196 = vmatpush3.bf16.msra.mxu1 %v1316_v38 }
  0x2e   : > { %1178 = vmatmul.mubr.bf16.vlgmr.msra.gmra.mrb[0].mxu0 %v319_v27 }
  0x2f   : > { %1181 = vmatprep.mubr.bf16.mxu0 %v320_v29 }
  0x36   : > { %1182 = vmatmul.mubr.bf16.gmra.mrb[4].mxu0 %v321_v35 }
  0x8f   : > { %v1619_v51 = vpop.permute.xlu0 %585 }
  0x90   : > { %v1621_v54 = vpop.permute.xlu1 %595 }
  0x93   : > { %v591_v1 = vpop.permute.xlu0 %590 }
  0x94   : > { %v601_v9 = vpop.permute.xlu1 %600 }
 0x101   : > { %v1179_v46 = vpop.f32.mrb[0].mxu0 }
 0x102   : > { %v457_v49 = vmul.f32 %v1179_v46, %v454_v44  ;;  %v420_v50 = vpop.f32.mrb[1].mxu0 }
 0x103   : > { %v455_v52 = vmul.f32 %v454_v44, %v420_v50  ;;  %v1180_v53 = vpop.f32.mrb[2].mxu0 }
 0x104   : > { %v469_v55 = vadd.f32 %v466_v45, %v457_v49  ;;  %v458_v56 = vmul.f32 %v1180_v53, %v454_v44  ;;  %v423_v57 = vpop.f32.mrb[3].mxu0  ;;  %v606_v49 = vpop.permute.xlu0 %605 }
 0x105   : > { %v467_v58 = vadd.f32 %v466_v45, %v455_v52  ;;  %v456_v59 = vmul.f32 %v454_v44, %v423_v57 }
 0x106   : > { %v477_v60 = vmax.f32 %v469_v55, 0.0  ;;  %v470_v61 = vadd.f32 %v466_v45, %v458_v56 }
 0x107   : > { %v468_v62 = vadd.f32 %v466_v45, %v456_v59  ;;  %v1630_v3 = vmax.f32 %v467_v58, 0.0 }
 0x108   : > { %v1626_v0 = vmax.f32 %v470_v61, 0.0  ;;  %v568_v2 = vrot.slane %v477_v60, 1  ;;  %v493_v7 = vrot.slane %v477_v60, 7 }
 0x109   : > { %v1632_v4 = vmax.f32 %v468_v62, 0.0  ;;  %v1183_v8 = vpop.f32.mrb[4].mxu0  ;;  %v566_v29 = vrot.slane %v1630_v3, 1 }
 0x10a   : > { %v569_v10 = vrot.slane %v1626_v0, 1  ;;  %v494_v11 = vrot.slane %v1626_v0, 7  ;;  %v461_v12 = vmul.f32 %v1183_v8, %v454_v44  ;;  %v436_v13 = vpop.f32.mrb[5].mxu0  ;;  %v1263_v14 = vpack.i.bf16 %v1626_v0, %v477_v60 }
 0x10b   : > { %v567_v15 = vrot.slane %v1632_v4, 1  ;;  %v492_v16 = vrot.slane %v1632_v4, 7  ;;  %v459_v17 = vmul.f32 %v454_v44, %v436_v13  ;;  %v1184_v18 = vpop.f32.mrb[6].mxu0  ;;  %v1268_v19 = vpack.i.bf16 %v1632_v4, %v1630_v3 }
 0x10c   : > { %v1645_v20 = vsel %vm501_vm0, %v493_v7, %v494_v11  ;;  %v473_v21 = vadd.f32 %v466_v45, %v461_v12  ;;  %v462_v26 = vmul.f32 %v1184_v18, %v454_v44  ;;  %1264 = vrot.lane.b32.xlu1 %v1263_v14, %s1384_s20  ;;  %v439_v27 = vpop.f32.mrb[7].mxu0  ;;  %v579_v28 = vsel %vm574_vm1, %v568_v2, %v569_v10 }
 0x10d   : > { %v1655_v30 = vsel %vm501_vm0, %v492_v16, %v493_v7  ;;  %v471_v31 = vadd.f32 %v466_v45, %v459_v17  ;;  %v460_v34 = vmul.f32 %v454_v44, %v439_v27  ;;  %1269 = vrot.lane.b32.xlu0 %v1268_v19, %s1384_s20  ;;  %v580_v37 = vsel %vm574_vm1, %v567_v15, %v568_v2  ;;  %v611_v44 = vpop.permute.xlu1 %610 }
 0x10e   : > { %v481_v35 = vmax.f32 %v473_v21, 0.0  ;;  %v474_v36 = vadd.f32 %v466_v45, %v462_v26  ;;  %v581_v47 = vsel %vm574_vm1, %v566_v29, %v567_v15  ;;  %v624_v48 = vmul.f32 %v591_v1, %v580_v37  ;;  %v616_v15 = vpop.permute.xlu0 %615 }
 0x10f   : > { %v479_v39 = vmax.f32 %v471_v31, 0.0  ;;  %v472_v46 = vadd.f32 %v466_v45, %v460_v34  ;;  %v623_v55 = vmul.f32 %v1619_v51, %v581_v47  ;;  %v625_v59 = vmul.f32 %v1621_v54, %v579_v28  ;;  %v1702_v31 = vld [vmem:[%s1830_s5] sm:$0xff]  }
 0x110   : > { %v572_v50 = vrot.slane %v481_v35, 1  ;;  %v482_v52 = vmax.f32 %v474_v36, 0.0  ;;  %v497_v53 = vrot.slane %v481_v35, 7  ;;  %1205 = vmatprep.subr.bf16.mxu1 %v1702_v31 }
 0x111   : > { %v495_v56 = vrot.slane %v479_v39, 7  ;;  %v570_v57 = vrot.slane %v479_v39, 1  ;;  %v480_v58 = vmax.f32 %v472_v46, 0.0  ;;  %v1273_v45 = vpack.i.bf16 %v624_v48, %v623_v55  ;;  %v621_v17 = vpop.permute.xlu1 %620 }
 0x112   : > { %v573_v60 = vrot.slane %v482_v52, 1  ;;  %v498_v61 = vrot.slane %v482_v52, 7  ;;  %v1288_v62 = vpack.i.bf16 %v482_v52, %v481_v35  ;;  %v513_v4 = vpop.permute.xlu0 %512 }
 0x113   : > { %v571_v63 = vrot.slane %v480_v58, 1  ;;  %v496_v1 = vrot.slane %v480_v58, 7  ;;  %v1278_v2 = vpack.i.bf16 %v480_v58, %v479_v39  ;;  %v578_v7 = vsel %vm574_vm1, %v569_v10, %v570_v57  ;;  %1274 = vrot.lane.b32.xlu0 %v1273_v45, %s1385_s10 }
 0x114   : > { %v1671_v51 = vsel %vm501_vm0, %v497_v53, %v498_v61  ;;  %v626_v8 = vmul.f32 %v601_v9, %v578_v7  ;;  %v575_v54 = vsel %vm574_vm1, %v572_v50, %v573_v60  ;;  %v582_v12 = vsel %vm574_vm1, %v573_v60, %v566_v29 }
 0x115   : > { %v1679_v13 = vsel %vm501_vm0, %v496_v1, %v497_v53  ;;  %v1683_v10 = vsel %vm501_vm0, %v495_v56, %v496_v1  ;;  %v576_v14 = vsel %vm574_vm1, %v571_v63, %v572_v50  ;;  %v491_v9 = vrot.slane %v1630_v3, 7 }
 0x116   : > { %v1283_v18 = vpack.i.bf16 %v626_v8, %v625_v59  ;;  %v577_v19 = vsel %vm574_vm1, %v570_v57, %v571_v63  ;;  %v628_v21 = vmul.f32 %v611_v44, %v576_v14  ;;  %v629_v27 = vmul.f32 %v616_v15, %v575_v54  ;;  %v523_v36 = vpop.permute.xlu0 %522 }
 0x117   : > { %v627_v26 = vmul.f32 %v606_v49, %v577_v19  ;;  %v630_v28 = vmul.f32 %v621_v17, %v582_v12  ;;  %v505_v29 = vsel %vm501_vm0, %v494_v11, %v495_v56  ;;  %1279 = vrot.lane.b32.xlu0 %v1278_v2, %s1384_s20  ;;  %v508_v3 = vsel %vm501_vm0, %v491_v9, %v492_v16  ;;  %v518_v11 = vpop.permute.xlu1 %517 }
 0x118   : > { %1284 = vrot.lane.b32.xlu1 %v1283_v18, %s1385_s10  ;;  %v509_v0 = vsel %vm501_vm0, %v498_v61, %v491_v9  ;;  %v551_v53 = vmul.f32 %v518_v11, %v508_v3 }
 0x119   : > { %v1293_v34 = vpack.i.bf16 %v628_v21, %v627_v26  ;;  %v1298_v35 = vpack.i.bf16 %v630_v28, %v629_v27  ;;  %v550_v52 = vmul.f32 %v513_v4, %v509_v0 }
 0x11a   : > { %v533_v37 = vpop.permute.xlu0 %532 }
 0x11b   : > { %1294 = vrot.lane.b32.xlu0 %v1293_v34, %s1385_s10  ;;  %v528_v16 = vpop.permute.xlu1 %527 }
 0x11c   : > { %1289 = vrot.lane.b32.xlu1 %v1288_v62, %s1384_s20  ;;  %v552_v62 = vmul.f32 %v523_v36, %v1655_v30  ;;  %v553_v63 = vmul.f32 %v528_v16, %v1645_v20  ;;  %v554_v30 = vmul.f32 %v533_v37, %v505_v29  ;;  %s1132_s20 = sshll.u32 %s1455_s9, 10  ;;  %s1784_s9 = scalar_lea.sflag [#allocation3], %s297_s17 }
 0x11d   : > { %s1775_s23 = scalar_lea.hbm %s1833_s8, %s1132_s20 }
 0x11e   : > { %v543_v39 = vpop.permute.xlu0 %542 }
 0x11f   : > { %v538_v38 = vpop.permute.xlu1 %537 }
 0x120   : > { %1299 = vrot.lane.b32.xlu1 %v1298_v35, %s1385_s10  ;;  %v555_v20 = vmul.f32 %v538_v38, %v1683_v10  ;;  %v556_v10 = vmul.f32 %v543_v39, %v1679_v13  ;;  %v845_v13 = vsub.s32 2, %v1598_v40 }
 0x122   : > { %v846_v39 = vrot.slane %v1604_v42, %v845_v13 }
 0x123   : > { %v548_v47 = vpop.permute.xlu1 %547 }
 0x124   : > { %v557_v29 = vmul.f32 %v548_v47, %v1671_v51  ;;  %v1318_v51 = vld [vmem:[%s1830_s5 + $0x8] sm:$0xff]  }
 0x17e   : > { %v1265_v44 = vpop.permute.xlu1 %1264 }
 0x17f   : > { %v1270_v46 = vpop.permute.xlu0 %1269  ;;  %v1267_v57 = vunpack.i.h.bf16 %v1265_v44  ;;  %v1266_v58 = vunpack.i.l.bf16 %v1265_v44 }
 0x180   : > { %v1272_v48 = vunpack.i.h.bf16 %v1270_v46  ;;  %v1271_v49 = vunpack.i.l.bf16 %v1270_v46 }
 0x181   : > { %v698_v12 = vsel %vm695_vm2, %v552_v62, %v1266_v58  ;;  %v699_v14 = vsel %vm695_vm2, %v553_v63, %v1267_v57 }
 0x182   : > { %v696_v59 = vsel %vm695_vm2, %v550_v52, %v1271_v49  ;;  %v697_v60 = vsel %vm695_vm2, %v551_v53, %v1272_v48 }
 0x185   : > { %v1275_v50 = vpop.permute.xlu0 %1274 }
 0x186   : > { %v1277_v55 = vunpack.i.h.bf16 %v1275_v50  ;;  %v1276_v56 = vunpack.i.l.bf16 %v1275_v50 }
 0x188   : > { %v705_v61 = vsel %vm704_vm3, %v696_v59, %v1276_v56  ;;  %v706_v45 = vsel %vm704_vm3, %v697_v60, %v1277_v55 }
 0x189   : > { %v1280_v1 = vpop.permute.xlu0 %1279  ;;  %v713_v7 = vpack.c.bf16 %v706_v45, %v705_v61 }
 0x18a   : > { %v1285_v2 = vpop.permute.xlu1 %1284  ;;  %v1282_v15 = vunpack.i.h.bf16 %v1280_v1  ;;  %v1281_v17 = vunpack.i.l.bf16 %v1280_v1 }
 0x18b   : > { %v1287_v8 = vunpack.i.h.bf16 %v1285_v2  ;;  %v1286_v54 = vunpack.i.l.bf16 %v1285_v2  ;;  %1197 = vmatprep.mubr.msk.bf16.mxu1 %vm765_vm4, %v713_v7 }
 0x18c   : > { %v700_v3 = vsel %vm695_vm2, %v554_v30, %v1281_v17  ;;  %v701_v34 = vsel %vm695_vm2, %v555_v20, %v1282_v15 }
 0x18d   : > { %v708_v9 = vsel %vm704_vm3, %v699_v14, %v1287_v8  ;;  %v707_v18 = vsel %vm704_vm3, %v698_v12, %v1286_v54  ;;  %v1295_v21 = vpop.permute.xlu0 %1294 }
 0x18e   : > { %v714_v19 = vpack.c.bf16 %v708_v9, %v707_v18  ;;  %v1290_v26 = vpop.permute.xlu1 %1289  ;;  %v1297_v27 = vunpack.i.h.bf16 %v1295_v21  ;;  %v1296_v28 = vunpack.i.l.bf16 %v1295_v21 }
 0x18f   : > { %v1292_v35 = vunpack.i.h.bf16 %v1290_v26  ;;  %v1291_v0 = vunpack.i.l.bf16 %v1290_v26 }
 0x190   : > { %1198 = vmatmul.mubr.msk.bf16.vlgmr.msra.gmra.mrb[0].mxu1 %vm765_vm4, %v714_v19  ;;  %v709_v4 = vsel %vm704_vm3, %v700_v3, %v1296_v28  ;;  %v710_v11 = vsel %vm704_vm3, %v701_v34, %v1297_v27 }
 0x191   : > { %1206 = vmatpush3.bf16.msra.mxu1 %v1702_v31  ;;  %v715_v36 = vpack.c.bf16 %v710_v11, %v709_v4  ;;  %v702_v46 = vsel %vm695_vm2, %v556_v10, %v1291_v0  ;;  %v703_v48 = vsel %vm695_vm2, %v557_v29, %v1292_v35  ;;  %v857_v31 = vsub.s32 3, %v1598_v40  ;;  %v317_v11 = vld [vmem:[%s1832_s7] sm:$0x3] }
 0x192   : > { %v1300_v16 = vpop.permute.xlu1 %1299  ;;  %1207 = vmatprep.subr.bf16.mxu1 %v1318_v51  ;;  %v975_v10 = vrot.slane %v317_v11, %v453_v41  ;;  %v987_v29 = vrot.slane %v317_v11, %v465_v43 }
 0x193   : > { %v1302_v37 = vunpack.i.h.bf16 %v1300_v16  ;;  %v1301_v38 = vunpack.i.l.bf16 %v1300_v16  ;;  %1201 = vmatprep.mubr.msk.bf16.mxu1 %vm765_vm4, %v715_v36  ;;  %v858_v47 = vrot.slane %v1604_v42, %v857_v31 }
 0x195   : > { %v711_v49 = vsel %vm704_vm3, %v702_v46, %v1301_v38  ;;  %v712_v44 = vsel %vm704_vm3, %v703_v48, %v1302_v37  ;;  %1208 = vmatpush3.bf16.msra.mxu1 %v1318_v51 }
 0x196   : > { %v716_v50 = vpack.c.bf16 %v712_v44, %v711_v49 }
 0x198   : > { %1202 = vmatmul.mubr.msk.bf16.gmra.mrb[4].mxu1 %vm765_vm4, %v716_v50 }
 0x263   : > { %v1199_v52 = vpop.f32.mrb[0].mxu1 }
 0x264   : > { %v849_v53 = vmul.f32 %v1199_v52, %v846_v39  ;;  %v812_v55 = vpop.f32.mrb[1].mxu1 }
 0x265   : > { %v847_v56 = vmul.f32 %v846_v39, %v812_v55  ;;  %v1200_v57 = vpop.f32.mrb[2].mxu1 }
 0x266   : > { %v861_v58 = vadd.f32 %v858_v47, %v849_v53  ;;  %v850_v59 = vmul.f32 %v1200_v57, %v846_v39  ;;  %v815_v60 = vpop.f32.mrb[3].mxu1 }
 0x267   : > { %v859_v61 = vadd.f32 %v858_v47, %v847_v56  ;;  %v848_v45 = vmul.f32 %v846_v39, %v815_v60 }
 0x268   : > { %v862_v62 = vadd.f32 %v858_v47, %v850_v59  ;;  %v869_v1 = vmax.f32 %v861_v58, 0.0 }
 0x269   : > { %v860_v63 = vadd.f32 %v858_v47, %v848_v45  ;;  %v867_v7 = vmax.f32 %v859_v61, 0.0 }
 0x26a   : > { %v870_v2 = vmax.f32 %v862_v62, 0.0 }
 0x26b   : > { %v868_v8 = vmax.f32 %v860_v63, 0.0  ;;  %v1203_v54 = vpop.f32.mrb[4].mxu1 }
 0x26c   : > { %v876_v12 = vpack.c.bf16 %v870_v2, %v869_v1  ;;  %v853_v14 = vmul.f32 %v1203_v54, %v846_v39  ;;  %v828_v42 = vpop.f32.mrb[5].mxu1 }
 0x26d   : > { %v875_v15 = vpack.c.bf16 %v868_v8, %v867_v7  ;;  %v851_v17 = vmul.f32 %v846_v39, %v828_v42  ;;  %v1204_v9 = vpop.f32.mrb[6].mxu1 }
 0x26e   : > { %v865_v18 = vadd.f32 %v858_v47, %v853_v14  ;;  %v854_v30 = vmul.f32 %v1204_v9, %v846_v39  ;;  %v831_v20 = vpop.f32.mrb[7].mxu1 }
 0x26f   : > { %v863_v19 = vadd.f32 %v858_v47, %v851_v17  ;;  %v852_v21 = vmul.f32 %v846_v39, %v831_v20  ;;  %1209 = vmatprep.mubr.msk.bf16.mxu1 %vm695_vm2, %v875_v15 }
 0x270   : > { %v866_v26 = vadd.f32 %v858_v47, %v854_v30  ;;  %1210 = vmatmul.mubr.msk.bf16.vlgmr.msra.gmra.mrb[8].mxu1 %vm695_vm2, %v876_v12  ;;  %v873_v28 = vmax.f32 %v865_v18, 0.0 }
 0x271   : > { %v864_v27 = vadd.f32 %v858_v47, %v852_v21  ;;  %v871_v34 = vmax.f32 %v863_v19, 0.0 }
 0x272   : > { %v874_v3 = vmax.f32 %v866_v26, 0.0 }
 0x273   : > { %v872_v35 = vmax.f32 %v864_v27, 0.0 }
 0x274   : > { %v878_v0 = vpack.c.bf16 %v874_v3, %v873_v28 }
 0x275   : > { %v877_v4 = vpack.c.bf16 %v872_v35, %v871_v34 }
 0x277   : > { %1213 = vmatprep.mubr.msk.bf16.mxu1 %vm695_vm2, %v877_v4 }
 0x278   : > { %1214 = vmatmul.mubr.msk.bf16.gmra.mrb[12].mxu1 %vm695_vm2, %v878_v0 }
 0x343   : > { %v1211_v36 = vpop.f32.mrb[8].mxu1 }
 0x344   : > { %v978_v16 = vmul.f32 %v1211_v36, %v975_v10  ;;  %v941_v37 = vpop.f32.mrb[9].mxu1 }
 0x345   : > { %v976_v38 = vmul.f32 %v975_v10, %v941_v37  ;;  %v1212_v46 = vpop.f32.mrb[10].mxu1 }
 0x346   : > { %v990_v48 = vadd.f32 %v987_v29, %v978_v16  ;;  %v979_v49 = vmul.f32 %v1212_v46, %v975_v10  ;;  %v944_v44 = vpop.f32.mrb[11].mxu1 }
 0x347   : > { %v988_v50 = vadd.f32 %v987_v29, %v976_v38  ;;  %v977_v51 = vmul.f32 %v975_v10, %v944_v44 }
 0x348   : > { %v998_v13 = vadd.f32 %v990_v48, %v1551_v22  ;;  %v991_v31 = vadd.f32 %v987_v29, %v979_v49 }
 0x349   : > { %v996_v41 = vadd.f32 %v988_v50, %v1501_v5  ;;  %v989_v40 = vadd.f32 %v987_v29, %v977_v51 }
 0x34a   : > { %v1006_v43 = vmax.f32 %v998_v13, 0.0  ;;  %v999_v39 = vadd.f32 %v991_v31, %v1554_v23 }
 0x34b   : > { %v1004_v47 = vmax.f32 %v996_v41, 0.0  ;;  %v997_v52 = vadd.f32 %v989_v40, %v1504_v6  ;;  %v1215_v53 = vpop.f32.mrb[12].mxu1 }
 0x34c   : > { %1014 = vst [vmem:[%s1759_s19 + $0x10] sm:$0xff] %v1006_v43  ;;  %v1007_v55 = vmax.f32 %v999_v39, 0.0  ;;  %v982_v22 = vmul.f32 %v1215_v53, %v975_v10  ;;  %v957_v56 = vpop.f32.mrb[13].mxu1 }
 0x34d   : > { %1012 = vst [vmem:[%s1759_s19] sm:$0xff] %v1004_v47  ;;  %v1005_v5 = vmax.f32 %v997_v52, 0.0  ;;  %v980_v57 = vmul.f32 %v975_v10, %v957_v56  ;;  %v1216_v23 = vpop.f32.mrb[14].mxu1 }
 0x34e   : > { %1015 = vst [vmem:[%s1759_s19 + $0x18] sm:$0xff] %v1007_v55  ;;  %v994_v58 = vadd.f32 %v987_v29, %v982_v22  ;;  %v983_v6 = vmul.f32 %v1216_v23, %v975_v10  ;;  %v960_v59 = vpop.f32.mrb[15].mxu1 }
 0x34f   : > { %1013 = vst [vmem:[%s1759_s19 + $0x8] sm:$0xff] %v1005_v5  ;;  %v992_v60 = vadd.f32 %v987_v29, %v980_v57  ;;  %v981_v61 = vmul.f32 %v975_v10, %v960_v59 }
 0x350   : > { %v1002_v45 = vadd.f32 %v994_v58, %v1579_v32  ;;  %v995_v62 = vadd.f32 %v987_v29, %v983_v6 }
 0x351   : > { %v1000_v63 = vadd.f32 %v992_v60, %v1557_v24  ;;  %v993_v1 = vadd.f32 %v987_v29, %v981_v61 }
 0x352   : > { %v1010_v2 = vmax.f32 %v1002_v45, 0.0  ;;  %v1003_v7 = vadd.f32 %v995_v62, %v1582_v33 }
 0x353   : > { %v1008_v8 = vmax.f32 %v1000_v63, 0.0  ;;  %v1001_v54 = vadd.f32 %v993_v1, %v1560_v25 }
 0x354   : > { %1018 = vst [vmem:[%s1759_s19 + $0x30] sm:$0xff] %v1010_v2  ;;  %v1011_v12 = vmax.f32 %v1003_v7, 0.0 }
 0x355   : > { %1016 = vst [vmem:[%s1759_s19 + $0x20] sm:$0xff] %v1008_v8  ;;  %v1009_v24 = vmax.f32 %v1001_v54, 0.0 }
 0x356   : > { %1019 = vst [vmem:[%s1759_s19 + $0x38] sm:$0xff] %v1011_v12 }
 0x357   : > { %1017 = vst [vmem:[%s1759_s19 + $0x28] sm:$0xff] %v1009_v24 }
 0x358   : > { %1332 = shalt.err (!%p1329_p3)
}
 0x359   : > { %s1333_s13 = scalar_lea.hbm %s1775_s23, 1024  ;;  %s1337_s19 = scalar_lea.hbm %s1833_s8, 2048 }
 0x35a   : > { %p1334_p4 = scmp.ne.s32.totalorder %s1775_s23, %s1333_s13  ;;  %p1338_p9 = scmp.lt.u32.totalorder %s1775_s23, %s1833_s8 }
 0x35b   : > { %p1339_p10 = scmp.lt.u32.totalorder %s1337_s19, %s1333_s13  ;;  %p1341_p12 = scmp.lt.u32.totalorder %s1333_s13, %s1775_s23 }
 0x35c   : > { %p1335_p7 = pnand %p1334_p4, %p1472_p5 }
 0x35d   : > { %p1340_p11 = por %p1339_p10, %p1338_p9 }
 0x35e   : > { %p1336_p8 = pneg %p1335_p7 }
 0x35f   : > { %p1342_p13 = por %p1341_p12, %p1340_p11 }
 0x361   : > { %p1343_p0 = pnand %p1342_p13, %p1336_p8 }
 0x363   : > { %1346 = shalt.err (!%p1343_p0)
}
 0x364   : > { %s1387_s10 = smov 128   ;;  %s1388_s24 = smov 8  }
 0x365   : > { %1217 = dma.vmem_to_hbm [thread:$0]  (%p1472_p5), %s1777_s21, 1024, %s1775_s23, %s1784_s9, %s1387_s10, %s1387_s10, %s1388_s24  }
 0x366 PF: > { %p1223_p1 = scmp.ge.s32.totalorder %s1381_s30, 2  ;;  %s1049_s25 = sand.u32 1, %s1369_s27  }
 0x367   : > { %s1050_s26 = scalar_lea.sflag [#allocation3], %s1049_s25 }
 0x368   : > { %p1220_p2 = pnand %p1223_p1, %p1476_p6 }
 0x36a   : > { %1364 = dma.done.wait (!%p1220_p2), %s1050_s26, 1024  }
 0x36b   : > { %1366 = vsyncadd (!%p1220_p2), %s1050_s26, 4294966272  ;;  %p18_p3 = scmp.ge.s32.totalorder %s1459_s11, 4   ;;  %s1836_s27 = smov %s1373_s28 }
 0x36c   : > { %s1837_s28 = smov %s1377_s29  ;;  %s1838_s29 = smov %s1470_s14 }
 0x36d   : > { %s1839_s30 = smov %s1459_s11  ;;  %20 = sbr.rel (!%p18_p3) target bundleno = 3 (0x3), region = 87 }
 0x374   :  { %1055 = vsyncpa [#allocation3], 1 }
 0x375   :  { %1057 = vsyncpa [#allocation3 + $0x1], 1 }

</bundles_post_ra>
